<compile_context>
chip_gen: v6e
topology: v6e:2x2x1
jax: 0.10.0
libtpu: 0.0.40
codegen_flags: <defaults>
</compile_context>

<pallas_src>
import functools

import numpy as np
import jax
import jax.numpy as jnp
from jax import lax
from jax.experimental import pallas as pl
from jax.experimental.pallas import tpu as pltpu

_PREC = lax.Precision.HIGHEST   # used only by the pure-JAX reference


def _leaky(v):
    return jnp.where(v >= 0, v, 0.2 * v)


# ----------------------------------- kernel ------------------------------------

def _disc_block_kernel(*refs, apply_fromrgb, H, W, Ct, Cp, mdt, prec):
    """One grid step = NB images, channels-last rows: rows = NB*H, lanes = W*C."""
    if apply_fromrgb:
        (x_ref, krgb_ref, brgb_ref, w0cat_ref, b0_ref,
         w1cat_ref, b1p_ref, prow_ref, out_ref) = refs
    else:
        (x_ref, w0cat_ref, b0_ref,
         w1cat_ref, b1p_ref, prow_ref, out_ref) = refs

    rows = x_ref.shape[0]
    WCt = W * Ct
    W2Cp = (W // 2) * Cp

    def mm(a, b):
        # matmul-dtype inputs, f32 accumulation (single native MXU pass for bf16).
        return jnp.dot(a.astype(mdt), b.astype(mdt), precision=prec,
                       preferred_element_type=jnp.float32)

    # Edge masks for the vertical +/-1 taps (image boundaries inside the block).
    def make_masks(width):
        ri = lax.broadcasted_iota(jnp.int32, (rows, width), 0) % H
        return ri != 0, ri != (H - 1)

    not_top0, not_bot0 = make_masks(WCt)
    if W2Cp == WCt:
        not_top1, not_bot1 = not_top0, not_bot0
    else:
        not_top1, not_bot1 = make_masks(W2Cp)

    def shift_dn(v, mask):   # out[p] = v[p-1], zeroed on image-top rows
        return jnp.where(mask, pltpu.roll(v, 1, 0), 0.0)

    def shift_up(v, mask):   # out[p] = v[p+1], zeroed on image-bottom rows
        return jnp.where(mask, pltpu.roll(v, rows - 1, 0), 0.0)

    x = x_ref[...]                                          # (rows, W*Cin)

    # fromrgb: 1x1 conv + bias + LeakyReLU (weight pre-expanded to kron(I_W, Wrgb)).
    if apply_fromrgb:
        x0 = _leaky(mm(x, krgb_ref[...]) + brgb_ref[...])   # (rows, W*Ct)
    else:
        x0 = x

    # One matmul produces all three horizontal conv0 taps AND the (col-pooled)
    # skip:  h = x0 @ [G0[-1] | G0[0] | G0[+1] | Qskip]
    h = mm(x0, w0cat_ref[...])                              # (rows, 3*WCt + W2Cp)
    hm = h[:, 0:WCt]
    hz = h[:, WCt:2 * WCt]
    hp = h[:, 2 * WCt:3 * WCt]
    skip_u = h[:, 3 * WCt:3 * WCt + W2Cp]                   # skip, un-row-pooled

    # conv0: vertical taps via roll+mask (no shift matrices), bias, LeakyReLU.
    acc0 = hz + shift_dn(hm, not_top0) + shift_up(hp, not_bot0)
    t = _leaky(acc0 + b0_ref[...])                          # (rows, WCt)

    # conv1 (column pool folded into weights): one matmul for all 3 taps.
    g = mm(t, w1cat_ref[...])                               # (rows, 3*W2Cp)
    gm = g[:, 0:W2Cp]
    gz = g[:, W2Cp:2 * W2Cp]
    gp = g[:, 2 * W2Cp:3 * W2Cp]
    acc1 = gz + shift_dn(gm, not_top1) + shift_up(gp, not_bot1)

    # Row half of the 2x2 average: pair-pool matmul. Bias rides through the pool.
    pr = prow_ref[...]                                      # (rows//2, rows)
    y = mm(pr, skip_u)                                      # skip path, pooled
    u = _leaky(mm(pr, acc1) + b1p_ref[...])                 # conv1 path, pooled
    out_ref[...] = y + u                                    # y.add_(x)


# ----------------------- host-side constant construction -----------------------

def _block_diag_1x1(w, W):
    """kron(I_W, w): (W*Cin, W*Cout) for a 1x1 conv applied per spatial column."""
    cin, cout = w.shape
    k = np.zeros((W * cin, W * cout), np.float32)
    for i in range(W):
        k[i * cin:(i + 1) * cin, i * cout:(i + 1) * cout] = w
    return k


def _banded_rows(w9, W):
    """Horizontal taps of a 3x3 conv as 3 banded (W*Cin, W*Cout) matrices.

    w9: (9, Cin, Cout), tap index k = (di+1)*3 + (dj+1).  Horizontal 'same'
    padding is baked in (zeros outside the image), so no edge masks are needed
    for the horizontal direction inside the kernel.
    """
    _, cin, cout = w9.shape
    g = np.zeros((3, W * cin, W * cout), np.float32)
    for di in (-1, 0, 1):
        for dj in (-1, 0, 1):
            tap = w9[(di + 1) * 3 + (dj + 1)]
            for w in range(W):
                wj = w + dj
                if 0 <= wj < W:
                    g[di + 1, wj * cin:(wj + 1) * cin, w * cout:(w + 1) * cout] = tap
    return g


def _col_pool_identity(W, C):
    """Horizontal half of the 2x2 average, per channel: (W*C, W2*C)."""
    w2 = W // 2
    r = np.zeros((W * C, w2 * C), np.float32)
    for q in range(w2):
        for a in (0, 1):
            w = 2 * q + a
            for c in range(C):
                r[w * C + c, q * C + c] = 0.5
    return r


def _col_pool_1x1(ws, W):
    """Skip path: (col-pool (x) Ws): (W*Ct, W2*Cp)."""
    ct, cp = ws.shape
    w2 = W // 2
    q = np.zeros((W * ct, w2 * cp), np.float32)
    for j in range(w2):
        for a in (0, 1):
            w = 2 * j + a
            q[w * ct:(w + 1) * ct, j * cp:(j + 1) * cp] = 0.5 * ws
    return q


def _pair_pool(rows):
    """Vertical half of the 2x2 average over stacked images (H even): (rows/2, rows)."""
    r2 = rows // 2
    p = np.zeros((r2, rows), np.float32)
    for r in range(r2):
        p[r, 2 * r] = 0.5
        p[r, 2 * r + 1] = 0.5
    return p


# ----------------------------------- factory ------------------------------------

def make_discriminator_block(params, *, inplanes, img_shape, block_batch=None,
                             target_rows=256, matmul_dtype=jnp.bfloat16):
    """Build per-weight-set constants once; return a jitted x_nchw -> out_nchw."""
    wrgb, brgb, w0, b0, w1, b1, ws = [np.asarray(p, np.float32) for p in params]
    N, Cin, H, W = img_shape
    assert H % 2 == 0 and W % 2 == 0, "bilinear 2x down needs even H, W"
    Ct, Cp = w0.shape[-1], w1.shape[-1]
    H2, W2 = H // 2, W // 2
    apply_fromrgb = (inplanes == 0)
    if not apply_fromrgb:
        assert Cin == w0.shape[1] == Ct, "inplanes != 0 path needs Cin == tmp_planes"

    # Pick NB so rows = NB*H fills the MXU height (~256 on v6e/v7x; pass
    # target_rows=128 for v5e).  For large N this still leaves >=2 grid steps for
    # v7x's two TensorCores; at tiny sizes filling rows wins over grid count.
    if block_batch is None:
        NB = 1
        for nb in range(1, N + 1):
            if (N % nb == 0 and nb * H <= max(target_rows, H)
                    and (nb * H) % 8 == 0 and (nb * H2) % 8 == 0):
                NB = nb
    else:
        NB = block_batch
    assert N % NB == 0
    assert (NB * H) % 8 == 0 and (NB * H2) % 8 == 0, "row block must be sublane-aligned"
    rows = NB * H

    mdt = np.dtype(matmul_dtype)
    prec = lax.Precision.HIGHEST if mdt == np.dtype(np.float32) else None

    # ---- host-side constant construction (done ONCE per weight set) ----
    g0 = _banded_rows(w0, W)                                  # (3, W*Ct, W*Ct)
    qskip = _col_pool_1x1(ws, W)                              # (W*Ct, W2*Cp)
    w0cat = jnp.asarray(np.concatenate([g0[0], g0[1], g0[2], qskip], axis=1), mdt)
    b0_row = jnp.asarray(np.tile(b0.reshape(1, Ct), (1, W)), jnp.float32)

    g1p = _banded_rows(w1, W) @ _col_pool_identity(W, Cp)     # (3, W*Ct, W2*Cp)
    w1cat = jnp.asarray(np.concatenate([g1p[0], g1p[1], g1p[2]], axis=1), mdt)
    b1p_row = jnp.asarray(np.tile(b1.reshape(1, Cp), (1, W2)), jnp.float32)

    prow = jnp.asarray(_pair_pool(rows), mdt)                 # (rows//2, rows)

    consts = []
    if apply_fromrgb:
        krgb = jnp.asarray(_block_diag_1x1(wrgb, W), mdt)
        brgb_row = jnp.asarray(np.tile(brgb.reshape(1, Ct), (1, W)), jnp.float32)
        consts += [krgb, brgb_row]
    consts += [w0cat, b0_row, w1cat, b1p_row, prow]

    in_specs = [pl.BlockSpec((rows, W * Cin), lambda i: (i, 0))]
    in_specs += [pl.BlockSpec(c.shape, lambda i: (0, 0)) for c in consts]
    out_spec = pl.BlockSpec((NB * H2, W2 * Cp), lambda i: (i, 0))

    steps = N // NB
    WCt, W2Cp = W * Ct, W2 * Cp
    flops_step = ((2 * rows * (W * Cin) * WCt if apply_fromrgb else 0)
                  + 2 * rows * WCt * (3 * WCt + W2Cp)     # conv0 taps + skip
                  + 2 * rows * WCt * (3 * W2Cp)           # conv1 taps
                  + 2 * rows * rows * W2Cp)               # two row-pool matmuls
    bytes_const = sum(int(np.prod(c.shape)) * c.dtype.itemsize for c in consts)
    cost = pl.CostEstimate(
        flops=int(steps * flops_step), transcendentals=0,
        bytes_accessed=int(N * H * W * Cin * mdt.itemsize
                           + N * H2 * W2Cp * 4 + bytes_const))

    kernel = functools.partial(
        _disc_block_kernel, apply_fromrgb=apply_fromrgb,
        H=H, W=W, Ct=Ct, Cp=Cp, mdt=mdt, prec=prec)

    call = pl.pallas_call(
        kernel,
        out_shape=jax.ShapeDtypeStruct((N * H2, W2Cp), jnp.float32),
        grid_spec=pltpu.PrefetchScalarGridSpec(
            num_scalar_prefetch=0, grid=(steps,),
            in_specs=in_specs, out_specs=out_spec),
        compiler_params=pltpu.CompilerParams(
            dimension_semantics=("parallel",),         # batch blocks independent
            vmem_limit_bytes=32 * 1024 * 1024),
        cost_estimate=cost,
    )

    def fwd(x_nchw):
        x = jnp.transpose(x_nchw, (0, 2, 3, 1)).astype(mdt)   # NCHW -> NHWC
        x2d = x.reshape(N * H, W * Cin)                       # rows = N*H, lanes = W*Cin
        out2d = call(x2d, *consts)
        out = out2d.reshape(N, H2, W2, Cp)
        return jnp.transpose(out, (0, 3, 1, 2))               # NHWC -> NCHW

    return jax.jit(fwd)


# ------------------------- pure-JAX reference (no Pallas) -----------------------

def _ref_forward(x_nchw, params):
    """Reference of DiscriminatorBlock.forward (inplanes == 0), f32 HIGHEST."""
    wrgb, brgb, w0, b0, w1, b1, ws = params
    x = jnp.transpose(x_nchw, (0, 2, 3, 1)).astype(jnp.float32)
    N, H, W, _ = x.shape
    Ct, Cp = w0.shape[-1], w1.shape[-1]
    w0_ = w0.reshape(3, 3, Ct, Ct)
    w1_ = w1.reshape(3, 3, Ct, Cp)

    def lk(v):
        return jnp.where(v >= 0, v, 0.2 * v)

    def conv3x3(v, w):
        vp = jnp.pad(v, ((0, 0), (1, 1), (1, 1), (0, 0)))
        out = jnp.zeros(v.shape[:3] + (w.shape[-1],), jnp.float32)
        for di in range(3):
            for dj in range(3):
                out = out + jnp.einsum('nhwc,cd->nhwd',
                                       vp[:, di:di + H, dj:dj + W, :],
                                       w[di, dj], precision=_PREC)
        return out

    def pool2(v):   # bilinear 2x down, align_corners=False == 2x2 average
        n, h, w, c = v.shape
        return v.reshape(n, h // 2, 2, w // 2, 2, c).mean(axis=(2, 4))

    x0 = lk(jnp.einsum('nhwc,cd->nhwd', x, wrgb, precision=_PREC) + brgb)
    y = pool2(jnp.einsum('nhwc,cd->nhwd', x0, ws, precision=_PREC))
    t = lk(conv3x3(x0, w0_) + b0)
    u = lk(pool2(conv3x3(t, w1_) + b1))
    out = y + u
    return jnp.transpose(out, (0, 3, 1, 2))


if __name__ == "__main__":
    # DiscriminatorBlock(inplanes=0, tmp_planes=8, planes=16, img_channels=4)
    N, Cin, H, W = 2, 4, 16, 16
    Ct, Cp = 8, 16

    key = jax.random.PRNGKey(0)
    ks = jax.random.split(key, 8)
    x = jax.random.normal(ks[0], (N, Cin, H, W), jnp.float32)        # NCHW input

    wrgb = jax.random.normal(ks[1], (Cin, Ct), jnp.float32) / np.sqrt(Cin)
    brgb = jax.random.normal(ks[2], (1, Ct), jnp.float32) * 0.1
    w0 = jax.random.normal(ks[3], (9, Ct, Ct), jnp.float32) / np.sqrt(9 * Ct)
    b0 = jax.random.normal(ks[4], (1, Ct), jnp.float32) * 0.1
    w1 = jax.random.normal(ks[5], (9, Ct, Cp), jnp.float32) / np.sqrt(9 * Ct)
    b1 = jax.random.normal(ks[6], (1, Cp), jnp.float32) * 0.1
    ws = jax.random.normal(ks[7], (Ct, Cp), jnp.float32) / np.sqrt(Ct)
    params = (wrgb, brgb, w0, b0, w1, b1, ws)

    ref = _ref_forward(x, params)

    # Fast (default) path: bf16 matmul inputs, f32 accumulation.
    fwd_fast = make_discriminator_block(params, inplanes=0, img_shape=(N, Cin, H, W))
    out_fast = jax.block_until_ready(fwd_fast(x))
    np.testing.assert_allclose(np.asarray(out_fast), np.asarray(ref),
                               rtol=2e-2, atol=2e-2)

    # Precise path: f32 / HIGHEST — validates the restructured (roll + concat-
    # weight + fused-pool) math tightly against the reference.
    fwd_exact = make_discriminator_block(params, inplanes=0, img_shape=(N, Cin, H, W),
                                         matmul_dtype=jnp.float32)
    out_exact = jax.block_until_ready(fwd_exact(x))
    np.testing.assert_allclose(np.asarray(out_exact), np.asarray(ref),
                               rtol=1e-3, atol=1e-3)

    print("KERNEL_OK")
</pallas_src>

<mosaic_0001>
module attributes {stable_mosaic.version = 11 : i64} {
  func.func @_disc_block_kernel(%arg0: i32, %arg1: memref<32x64xbf16, #tpu.memory_space<vmem>>, %arg2: memref<64x128xbf16, #tpu.memory_space<vmem>>, %arg3: memref<1x128xf32, #tpu.memory_space<vmem>>, %arg4: memref<128x512xbf16, #tpu.memory_space<vmem>>, %arg5: memref<1x128xf32, #tpu.memory_space<vmem>>, %arg6: memref<128x384xbf16, #tpu.memory_space<vmem>>, %arg7: memref<1x128xf32, #tpu.memory_space<vmem>>, %arg8: memref<16x32xbf16, #tpu.memory_space<vmem>>, %arg9: memref<16x128xf32, #tpu.memory_space<vmem>>) attributes {dimension_semantics = [#tpu.dimension_semantics<parallel>], iteration_bounds = array<i64: 1>, scalar_prefetch = 0 : i64, scratch_operands = 0 : i64, tpu.core_type = #tpu.core_type<tc>, window_params = [{transform_indices = @transform_0, window_bounds = array<i64: 32, 64>}, {pipeline_mode = #tpu.pipeline_mode<synchronous>, transform_indices = @transform_1, window_bounds = array<i64: 64, 128>}, {pipeline_mode = #tpu.pipeline_mode<synchronous>, transform_indices = @transform_2, window_bounds = array<i64: 1, 128>}, {pipeline_mode = #tpu.pipeline_mode<synchronous>, transform_indices = @transform_3, window_bounds = array<i64: 128, 512>}, {pipeline_mode = #tpu.pipeline_mode<synchronous>, transform_indices = @transform_4, window_bounds = array<i64: 1, 128>}, {pipeline_mode = #tpu.pipeline_mode<synchronous>, transform_indices = @transform_5, window_bounds = array<i64: 128, 384>}, {pipeline_mode = #tpu.pipeline_mode<synchronous>, transform_indices = @transform_6, window_bounds = array<i64: 1, 128>}, {pipeline_mode = #tpu.pipeline_mode<synchronous>, transform_indices = @transform_7, window_bounds = array<i64: 16, 32>}, {transform_indices = @transform_8, window_bounds = array<i64: 16, 128>}]} {
    %0 = tpu.iota {dimensions = array<i32: 0>} : vector<32x128xi32>
    %c16_i32 = arith.constant 16 : i32
    %c0_i32 = arith.constant 0 : i32
    %1 = arith.cmpi eq, %c16_i32, %c0_i32 : i32
    %c1_i32 = arith.constant 1 : i32
    %2 = arith.select %1, %c1_i32, %c16_i32 : i32
    %3 = vector.broadcast %2 : i32 to vector<32x128xi32>
    %4 = arith.remsi %0, %3 : vector<32x128xi32>
    %c0_i32_0 = arith.constant 0 : i32
    %5 = vector.broadcast %c0_i32_0 : i32 to vector<32x128xi32>
    %6 = arith.cmpi ne, %4, %5 : vector<32x128xi32>
    %c0_i32_1 = arith.constant 0 : i32
    %7 = vector.broadcast %c0_i32_1 : i32 to vector<32x128xi32>
    %8 = arith.cmpi slt, %4, %7 : vector<32x128xi32>
    %c0_i32_2 = arith.constant 0 : i32
    %9 = arith.cmpi slt, %2, %c0_i32_2 : i32
    %10 = vector.broadcast %9 : i1 to vector<32x128xi1>
    %11 = vector.broadcast %10 : vector<32x128xi1> to vector<32x128xi1>
    %12 = arith.xori %8, %11 : vector<32x128xi1>
    %13 = arith.andi %12, %6 : vector<32x128xi1>
    %14 = vector.broadcast %2 : i32 to vector<32x128xi32>
    %15 = arith.addi %4, %14 : vector<32x128xi32>
    %16 = arith.select %13, %15, %4 : vector<32x128xi1>, vector<32x128xi32>
    %c0_i32_3 = arith.constant 0 : i32
    %17 = vector.broadcast %c0_i32_3 : i32 to vector<32x128xi32>
    %18 = arith.cmpi ne, %16, %17 : vector<32x128xi32>
    %c15_i32 = arith.constant 15 : i32
    %19 = vector.broadcast %c15_i32 : i32 to vector<32x128xi32>
    %20 = arith.cmpi ne, %16, %19 : vector<32x128xi32>
    %c0 = arith.constant 0 : index
    %c0_4 = arith.constant 0 : index
    %21 = vector.load %arg1[%c0, %c0_4] : memref<32x64xbf16, #tpu.memory_space<vmem>>, vector<32x64xbf16>
    %c0_5 = arith.constant 0 : index
    %c0_6 = arith.constant 0 : index
    %22 = vector.load %arg2[%c0_5, %c0_6] : memref<64x128xbf16, #tpu.memory_space<vmem>>, vector<64x128xbf16>
    %cst = arith.constant dense<0.000000e+00> : vector<32x128xf32>
    %23 = tpu.matmul %21, %22, %cst {dimension_numbers = #tpu.dot_dimension_numbers<[1], [0], [0], [1], [0, 0, 1, 1], [], []>} : vector<32x64xbf16>, vector<64x128xbf16>, vector<32x128xf32> -> vector<32x128xf32>
    %c0_7 = arith.constant 0 : index
    %c0_8 = arith.constant 0 : index
    %24 = vector.load %arg3[%c0_7, %c0_8] : memref<1x128xf32, #tpu.memory_space<vmem>>, vector<1x128xf32>
    %25 = vector.broadcast %24 : vector<1x128xf32> to vector<32x128xf32>
    %26 = arith.addf %23, %25 : vector<32x128xf32>
    %cst_9 = arith.constant 0.000000e+00 : f32
    %27 = vector.broadcast %cst_9 : f32 to vector<32x128xf32>
    %28 = arith.cmpf oge, %26, %27 : vector<32x128xf32>
    %cst_10 = arith.constant 2.000000e-01 : f32
    %29 = vector.broadcast %cst_10 : f32 to vector<32x128xf32>
    %30 = arith.mulf %29, %26 : vector<32x128xf32>
    %31 = arith.select %28, %26, %30 : vector<32x128xi1>, vector<32x128xf32>
    %c0_11 = arith.constant 0 : index
    %c0_12 = arith.constant 0 : index
    %32 = vector.load %arg4[%c0_11, %c0_12] : memref<128x512xbf16, #tpu.memory_space<vmem>>, vector<128x512xbf16>
    %33 = arith.truncf %31 : vector<32x128xf32> to vector<32x128xbf16>
    %cst_13 = arith.constant dense<0.000000e+00> : vector<32x512xf32>
    %34 = tpu.matmul %33, %32, %cst_13 {dimension_numbers = #tpu.dot_dimension_numbers<[1], [0], [0], [1], [0, 0, 1, 1], [], []>} : vector<32x128xbf16>, vector<128x512xbf16>, vector<32x512xf32> -> vector<32x512xf32>
    %35 = vector.extract_strided_slice %34 {offsets = [0, 0], sizes = [32, 128], strides = [1, 1]} : vector<32x512xf32> to vector<32x128xf32>
    %36 = vector.extract_strided_slice %34 {offsets = [0, 128], sizes = [32, 128], strides = [1, 1]} : vector<32x512xf32> to vector<32x128xf32>
    %37 = vector.extract_strided_slice %34 {offsets = [0, 256], sizes = [32, 128], strides = [1, 1]} : vector<32x512xf32> to vector<32x128xf32>
    %38 = vector.extract_strided_slice %34 {offsets = [0, 384], sizes = [32, 128], strides = [1, 1]} : vector<32x512xf32> to vector<32x128xf32>
    %c1_i32_14 = arith.constant 1 : i32
    %39 = tpu.dynamic_rotate %35 by %c1_i32_14 dim 0 : vector<32x128xf32>, i32 -> vector<32x128xf32>
    %cst_15 = arith.constant 0.000000e+00 : f32
    %40 = vector.broadcast %cst_15 : f32 to vector<32x128xf32>
    %41 = arith.select %18, %39, %40 : vector<32x128xi1>, vector<32x128xf32>
    %42 = arith.addf %36, %41 : vector<32x128xf32>
    %c31_i32 = arith.constant 31 : i32
    %43 = tpu.dynamic_rotate %37 by %c31_i32 dim 0 : vector<32x128xf32>, i32 -> vector<32x128xf32>
    %cst_16 = arith.constant 0.000000e+00 : f32
    %44 = vector.broadcast %cst_16 : f32 to vector<32x128xf32>
    %45 = arith.select %20, %43, %44 : vector<32x128xi1>, vector<32x128xf32>
    %46 = arith.addf %42, %45 : vector<32x128xf32>
    %c0_17 = arith.constant 0 : index
    %c0_18 = arith.constant 0 : index
    %47 = vector.load %arg5[%c0_17, %c0_18] : memref<1x128xf32, #tpu.memory_space<vmem>>, vector<1x128xf32>
    %48 = vector.broadcast %47 : vector<1x128xf32> to vector<32x128xf32>
    %49 = arith.addf %46, %48 : vector<32x128xf32>
    %cst_19 = arith.constant 0.000000e+00 : f32
    %50 = vector.broadcast %cst_19 : f32 to vector<32x128xf32>
    %51 = arith.cmpf oge, %49, %50 : vector<32x128xf32>
    %cst_20 = arith.constant 2.000000e-01 : f32
    %52 = vector.broadcast %cst_20 : f32 to vector<32x128xf32>
    %53 = arith.mulf %52, %49 : vector<32x128xf32>
    %54 = arith.select %51, %49, %53 : vector<32x128xi1>, vector<32x128xf32>
    %c0_21 = arith.constant 0 : index
    %c0_22 = arith.constant 0 : index
    %55 = vector.load %arg6[%c0_21, %c0_22] : memref<128x384xbf16, #tpu.memory_space<vmem>>, vector<128x384xbf16>
    %56 = arith.truncf %54 : vector<32x128xf32> to vector<32x128xbf16>
    %cst_23 = arith.constant dense<0.000000e+00> : vector<32x384xf32>
    %57 = tpu.matmul %56, %55, %cst_23 {dimension_numbers = #tpu.dot_dimension_numbers<[1], [0], [0], [1], [0, 0, 1, 1], [], []>} : vector<32x128xbf16>, vector<128x384xbf16>, vector<32x384xf32> -> vector<32x384xf32>
    %58 = vector.extract_strided_slice %57 {offsets = [0, 0], sizes = [32, 128], strides = [1, 1]} : vector<32x384xf32> to vector<32x128xf32>
    %59 = vector.extract_strided_slice %57 {offsets = [0, 128], sizes = [32, 128], strides = [1, 1]} : vector<32x384xf32> to vector<32x128xf32>
    %60 = vector.extract_strided_slice %57 {offsets = [0, 256], sizes = [32, 128], strides = [1, 1]} : vector<32x384xf32> to vector<32x128xf32>
    %c1_i32_24 = arith.constant 1 : i32
    %61 = tpu.dynamic_rotate %58 by %c1_i32_24 dim 0 : vector<32x128xf32>, i32 -> vector<32x128xf32>
    %cst_25 = arith.constant 0.000000e+00 : f32
    %62 = vector.broadcast %cst_25 : f32 to vector<32x128xf32>
    %63 = arith.select %18, %61, %62 : vector<32x128xi1>, vector<32x128xf32>
    %64 = arith.addf %59, %63 : vector<32x128xf32>
    %c31_i32_26 = arith.constant 31 : i32
    %65 = tpu.dynamic_rotate %60 by %c31_i32_26 dim 0 : vector<32x128xf32>, i32 -> vector<32x128xf32>
    %cst_27 = arith.constant 0.000000e+00 : f32
    %66 = vector.broadcast %cst_27 : f32 to vector<32x128xf32>
    %67 = arith.select %20, %65, %66 : vector<32x128xi1>, vector<32x128xf32>
    %68 = arith.addf %64, %67 : vector<32x128xf32>
    %c0_28 = arith.constant 0 : index
    %c0_29 = arith.constant 0 : index
    %69 = vector.load %arg8[%c0_28, %c0_29] : memref<16x32xbf16, #tpu.memory_space<vmem>>, vector<16x32xbf16>
    %70 = arith.truncf %38 : vector<32x128xf32> to vector<32x128xbf16>
    %cst_30 = arith.constant dense<0.000000e+00> : vector<16x128xf32>
    %71 = tpu.matmul %69, %70, %cst_30 {dimension_numbers = #tpu.dot_dimension_numbers<[1], [0], [0], [1], [0, 0, 1, 1], [], []>} : vector<16x32xbf16>, vector<32x128xbf16>, vector<16x128xf32> -> vector<16x128xf32>
    %72 = arith.truncf %68 : vector<32x128xf32> to vector<32x128xbf16>
    %cst_31 = arith.constant dense<0.000000e+00> : vector<16x128xf32>
    %73 = tpu.matmul %69, %72, %cst_31 {dimension_numbers = #tpu.dot_dimension_numbers<[1], [0], [0], [1], [0, 0, 1, 1], [], []>} : vector<16x32xbf16>, vector<32x128xbf16>, vector<16x128xf32> -> vector<16x128xf32>
    %c0_32 = arith.constant 0 : index
    %c0_33 = arith.constant 0 : index
    %74 = vector.load %arg7[%c0_32, %c0_33] : memref<1x128xf32, #tpu.memory_space<vmem>>, vector<1x128xf32>
    %75 = vector.broadcast %74 : vector<1x128xf32> to vector<16x128xf32>
    %76 = arith.addf %73, %75 : vector<16x128xf32>
    %cst_34 = arith.constant 0.000000e+00 : f32
    %77 = vector.broadcast %cst_34 : f32 to vector<16x128xf32>
    %78 = arith.cmpf oge, %76, %77 : vector<16x128xf32>
    %cst_35 = arith.constant 2.000000e-01 : f32
    %79 = vector.broadcast %cst_35 : f32 to vector<16x128xf32>
    %80 = arith.mulf %79, %76 : vector<16x128xf32>
    %81 = arith.select %78, %76, %80 : vector<16x128xi1>, vector<16x128xf32>
    %82 = arith.addf %71, %81 : vector<16x128xf32>
    %c0_36 = arith.constant 0 : index
    %c0_37 = arith.constant 0 : index
    %83 = vector.load %arg9[%c0_36, %c0_37] : memref<16x128xf32, #tpu.memory_space<vmem>>, vector<16x128xf32>
    tpu.vector_store %arg9[%c0_36, %c0_37], %82 {strides = array<i32>} : memref<16x128xf32, #tpu.memory_space<vmem>>, vector<16x128xf32>,
    return
  }
  func.func @transform_0(%arg0: i32) -> (i32, i32) {
    %c0_i32 = arith.constant 0 : i32
    %c0_i32_0 = arith.constant 0 : i32
    return %arg0, %c0_i32 : i32, i32
  }
  func.func @transform_1(%arg0: i32) -> (i32, i32) {
    %c0_i32 = arith.constant 0 : i32
    %c0_i32_0 = arith.constant 0 : i32
    %c0_i32_1 = arith.constant 0 : i32
    return %c0_i32, %c0_i32_0 : i32, i32
  }
  func.func @transform_2(%arg0: i32) -> (i32, i32) {
    %c0_i32 = arith.constant 0 : i32
    %c0_i32_0 = arith.constant 0 : i32
    %c0_i32_1 = arith.constant 0 : i32
    return %c0_i32, %c0_i32_0 : i32, i32
  }
  func.func @transform_3(%arg0: i32) -> (i32, i32) {
    %c0_i32 = arith.constant 0 : i32
    %c0_i32_0 = arith.constant 0 : i32
    %c0_i32_1 = arith.constant 0 : i32
    return %c0_i32, %c0_i32_0 : i32, i32
  }
  func.func @transform_4(%arg0: i32) -> (i32, i32) {
    %c0_i32 = arith.constant 0 : i32
    %c0_i32_0 = arith.constant 0 : i32
    %c0_i32_1 = arith.constant 0 : i32
    return %c0_i32, %c0_i32_0 : i32, i32
  }
  func.func @transform_5(%arg0: i32) -> (i32, i32) {
    %c0_i32 = arith.constant 0 : i32
    %c0_i32_0 = arith.constant 0 : i32
    %c0_i32_1 = arith.constant 0 : i32
    return %c0_i32, %c0_i32_0 : i32, i32
  }
  func.func @transform_6(%arg0: i32) -> (i32, i32) {
    %c0_i32 = arith.constant 0 : i32
    %c0_i32_0 = arith.constant 0 : i32
    %c0_i32_1 = arith.constant 0 : i32
    return %c0_i32, %c0_i32_0 : i32, i32
  }
  func.func @transform_7(%arg0: i32) -> (i32, i32) {
    %c0_i32 = arith.constant 0 : i32
    %c0_i32_0 = arith.constant 0 : i32
    %c0_i32_1 = arith.constant 0 : i32
    return %c0_i32, %c0_i32_0 : i32, i32
  }
  func.func @transform_8(%arg0: i32) -> (i32, i32) {
    %c0_i32 = arith.constant 0 : i32
    %c0_i32_0 = arith.constant 0 : i32
    return %arg0, %c0_i32 : i32, i32
  }
}

</mosaic_0001>

<bundles_post_ra>
// kernel: fwd.1
= control target key start
LH: loop header
LB: loop body
LE: loop exit
PB: predicated region body
PF: predicated region fallthrough
CT: control target
= control target key end

     0   :  { %13 = vsyncpa [#allocation3], 0  ;;  %s1251_s27 = smov [#allocation2]   ;;  %s1591_s0 = inlined_call_operand.vmem [shape: bf16[32,64], index: 0, kind: input, shape index: {}]   ;;  %s1592_s1 = inlined_call_operand.hbm [shape: bf16[64,128], index: 1, kind: input, shape index: {}]   ;;  %s1593_s2 = inlined_call_operand.vmem [shape: f32[1,128], index: 2, kind: input, shape index: {}]   ;;  %s1594_s3 = inlined_call_operand.vmem [shape: bf16[128,512], index: 3, kind: input, shape index: {}]   ;;  %s1595_s4 = inlined_call_operand.vmem [shape: f32[1,128], index: 4, kind: input, shape index: {}]   ;;  %s1596_s5 = inlined_call_operand.vmem [shape: bf16[128,384], index: 5, kind: input, shape index: {}]   ;;  %s1597_s6 = inlined_call_operand.vmem [shape: f32[1,128], index: 6, kind: input, shape index: {}]   ;;  %s1598_s7 = inlined_call_operand.vmem [shape: bf16[16,32], index: 7, kind: input, shape index: {}]   ;;  %s1599_s8 = inlined_call_operand.vmem [shape: f32[16,128], index: 8, kind: output, shape index: {}]  }
   0x1   :  { %s21_s28 = sshll.u32 %s1251_s27, 4  ;;  %s22_s28 = int_to_ptr.vmem [resolvable:$true] %s21_s28 }
   0x2   :  { %s1237_s29 = scalar_lea.vmem %s22_s28, 512  ;;  %p1242_p1 = scmp.lt.s32.totalorder %s22_s28, %s22_s28 }
   0x3   :  { %p1238_p0 = scmp.ne.s32.totalorder %s22_s28, %s1237_s29  ;;  %p1243_p2 = scmp.lt.s32.totalorder %s1237_s29, %s1237_s29 }
   0x5   :  { %p1244_p3 = por %p1243_p2, %p1242_p1 }
   0x7   :  { %p1245_p4 = pnand %p1244_p3, %p1238_p0 }
   0x9   :  { %1248 = shalt.err (!%p1245_p4)
}
   0xa   :  { %s1252_s30 = smov 64   ;;  %s1253_s9 = smov 4  }
   0xb   :  { %27 = dma.hbm_to_vmem [thread:$0]  %s1592_s1, 512, %s22_s28, [#allocation3], %s1252_s30, %s1252_s30, %s1253_s9  }
   0xc   :  { %1249 = dma.done.wait [#allocation3], 512  }
   0xd   :  { %1250 = vsyncadd [#allocation3], 4294966784  ;;  %v1142_v0 = vld [vmem:[#allocation2 + $0x18] sm:$0xff]   ;;  %v1143_v1 = vld [vmem:[#allocation2 + $0x10] sm:$0xff]   ;;  %vm158_vm0 = vcmask 523264   ;;  %v1254_v38 = vmov 0  }
   0xe   :  { %1088 = vmatprep.subr.bf16.mxu0 %v1142_v0  ;;  %v1144_v2 = vld [vmem:[#allocation2 + $0x8] sm:$0xff]   ;;  %v1146_v3 = vld [vmem:[%s1591_s0] sm:$0xff]   ;;  %452 = vmatprep.mubr.bf16.mxu1 %v1254_v38  ;;  %v1199_v40 = vld [vmem:[%s1596_s5 + $0xb0] ss:$12 sps:$4 sm:$0xff]   ;;  %vm897_vm15 = vcmask 261120  }
   0xf   :  { %1089 = vmatpush3.bf16.msra.mxu0 %v1142_v0  ;;  %1096 = vmatprep.mubr.msk.bf16.mxu0 %vm158_vm0, %v1146_v3  ;;  %v1148_v4 = vld [vmem:[%s1594_s3 + $0xe4] ss:$16 sps:$4 sm:$0xff]   ;;  %v1153_v6 = vld [vmem:[%s1594_s3 + $0xe0] ss:$16 sps:$4 sm:$0xff]   ;;  %v1152_v8 = vld [vmem:[%s1594_s3 + $0xec] ss:$16 sps:$4 sm:$0xff]  }
  0x10   :  { %1090 = vmatprep.subr.bf16.mxu0 %v1143_v1  ;;  %v1145_v5 = vld [vmem:[#allocation2] sm:$0xff]   ;;  %420 = vmatprep.subr.bf16.mxu1 %v1148_v4  ;;  %v1147_v11 = vld [vmem:[%s1591_s0 + $0x8] sm:$0xff]   ;;  %v1200_v63 = vld [vmem:[%s1596_s5 + $0x90] ss:$12 sps:$4 sm:$0xff]  }
  0x11   :  { %v1154_v7 = vld [vmem:[%s1594_s3 + $0xc4] ss:$16 sps:$4 sm:$0xff]   ;;  %421 = vmatpush1.bf16.msra.mxu1 %v1153_v6  ;;  %v1159_v9 = vld [vmem:[%s1594_s3 + $0xc0] ss:$16 sps:$4 sm:$0xff]   ;;  %v1150_v12 = vld [vmem:[%s1594_s3 + $0xe8] ss:$16 sps:$4 sm:$0xff]  }
  0x12   :  { %422 = vmatprep.subr.bf16.mxu1 %v1154_v7  ;;  %v1160_v10 = vld [vmem:[%s1594_s3 + $0xa4] ss:$16 sps:$4 sm:$0xff]   ;;  %v1165_v13 = vld [vmem:[%s1594_s3 + $0xa0] ss:$16 sps:$4 sm:$0xff]   ;;  %v1158_v15 = vld [vmem:[%s1594_s3 + $0xcc] ss:$16 sps:$4 sm:$0xff]  }
  0x13   :  { %1091 = vmatpush3.bf16.msra.mxu0 %v1143_v1  ;;  %v1166_v14 = vld [vmem:[%s1594_s3 + $0x84] ss:$16 sps:$4 sm:$0xff]   ;;  %v1156_v16 = vld [vmem:[%s1594_s3 + $0xc8] ss:$16 sps:$4 sm:$0xff]   ;;  %v1164_v17 = vld [vmem:[%s1594_s3 + $0xac] ss:$16 sps:$4 sm:$0xff]  }
  0x14   :  { %1092 = vmatprep.subr.bf16.mxu0 %v1144_v2  ;;  %v1171_v18 = vld [vmem:[%s1594_s3 + $0x80] ss:$16 sps:$4 sm:$0xff]   ;;  %v1172_v19 = vld [vmem:[%s1594_s3 + $0x64] ss:$16 sps:$4 sm:$0xff]   ;;  %v1162_v21 = vld [vmem:[%s1594_s3 + $0xa8] ss:$16 sps:$4 sm:$0xff]  }
  0x15   :  { %423 = vmatpush1.bf16.msra.mxu1 %v1159_v9  ;;  %v1177_v20 = vld [vmem:[%s1594_s3 + $0x60] ss:$16 sps:$4 sm:$0xff]   ;;  %v1170_v22 = vld [vmem:[%s1594_s3 + $0x8c] ss:$16 sps:$4 sm:$0xff]   ;;  %v1168_v23 = vld [vmem:[%s1594_s3 + $0x88] ss:$16 sps:$4 sm:$0xff]  }
  0x16   :  { %424 = vmatprep.subr.bf16.mxu1 %v1160_v10  ;;  %v1176_v24 = vld [vmem:[%s1594_s3 + $0x6c] ss:$16 sps:$4 sm:$0xff]   ;;  %v1174_v25 = vld [vmem:[%s1594_s3 + $0x68] ss:$16 sps:$4 sm:$0xff]   ;;  %v1178_v26 = vld [vmem:[%s1594_s3 + $0x44] ss:$16 sps:$4 sm:$0xff]  }
  0x17   :  { %1093 = vmatpush3.bf16.msra.mxu0 %v1144_v2  ;;  %v1182_v27 = vld [vmem:[%s1594_s3 + $0x4c] ss:$16 sps:$4 sm:$0xff]   ;;  %v1180_v28 = vld [vmem:[%s1594_s3 + $0x48] ss:$16 sps:$4 sm:$0xff]   ;;  %v1183_v29 = vld [vmem:[%s1594_s3 + $0x40] ss:$16 sps:$4 sm:$0xff]  }
  0x18   :  { %1094 = vmatprep.subr.bf16.mxu0 %v1145_v5  ;;  %v1184_v30 = vld [vmem:[%s1594_s3 + $0x24] ss:$16 sps:$4 sm:$0xff]   ;;  %v1188_v31 = vld [vmem:[%s1594_s3 + $0x2c] ss:$16 sps:$4 sm:$0xff]   ;;  %v1186_v32 = vld [vmem:[%s1594_s3 + $0x28] ss:$16 sps:$4 sm:$0xff]  }
  0x19   :  { %425 = vmatpush1.bf16.msra.mxu1 %v1165_v13  ;;  %v1189_v33 = vld [vmem:[%s1594_s3 + $0x20] ss:$16 sps:$4 sm:$0xff]   ;;  %v1190_v34 = vld [vmem:[%s1594_s3 + $0x4] ss:$16 sps:$4 sm:$0xff]   ;;  %v1194_v35 = vld [vmem:[%s1594_s3 + $0xc] ss:$16 sps:$4 sm:$0xff]  }
  0x1a   :  { %426 = vmatprep.subr.bf16.mxu1 %v1166_v14  ;;  %v1192_v36 = vld [vmem:[%s1594_s3 + $0x8] ss:$16 sps:$4 sm:$0xff]   ;;  %v1195_v37 = vld [vmem:[%s1594_s3] ss:$16 sps:$4 sm:$0xff]  }
  0x1b   :  { %1095 = vmatpush3.bf16.msra.mxu0 %v1145_v5  ;;  %v1198_v39 = vld [vmem:[%s1596_s5 + $0xac] ss:$12 sps:$4 sm:$0xff]   ;;  %v996_v42 = vld [vmem:[%s1593_s2] ss:$0 sm:$0xff]  ;;  %v1196_v55 = vld [vmem:[%s1596_s5 + $0xa8] ss:$12 sps:$4 sm:$0xff]  }
  0x1c   :  { %473 = vmatprep.subr.bf16.mxu0 %v1152_v8  ;;  %v1202_v61 = vld [vmem:[%s1596_s5 + $0x94] ss:$12 sps:$4 sm:$0xff]   ;;  %v1203_v62 = vld [vmem:[%s1596_s5 + $0x98] ss:$12 sps:$4 sm:$0xff]   ;;  %v1206_v0 = vld [vmem:[%s1596_s5 + $0x7c] ss:$12 sps:$4 sm:$0xff]  }
  0x1d   :  { %427 = vmatpush1.bf16.msra.mxu1 %v1171_v18  ;;  %v1207_v1 = vld [vmem:[%s1596_s5 + $0x80] ss:$12 sps:$4 sm:$0xff]   ;;  %v1204_v2 = vld [vmem:[%s1596_s5 + $0x78] ss:$12 sps:$4 sm:$0xff]   ;;  %v1211_v4 = vld [vmem:[%s1596_s5 + $0x68] ss:$12 sps:$4 sm:$0xff]  }
  0x1e   :  { %1097 = vmatmul.mubr.msk.bf16.vlgmr.msra.gmra.mxu0 %vm158_vm0, %v1147_v11  ;;  %428 = vmatprep.subr.bf16.mxu1 %v1172_v19  ;;  %v1210_v3 = vld [vmem:[%s1596_s5 + $0x64] ss:$12 sps:$4 sm:$0xff]   ;;  %v1208_v5 = vld [vmem:[%s1596_s5 + $0x60] ss:$12 sps:$4 sm:$0xff]   ;;  %v1212_v8 = vld [vmem:[%s1596_s5 + $0x48] ss:$12 sps:$4 sm:$0xff]   ;;  %v44_v19 = vlaneseq }
  0x1f   :  { %474 = vmatpush1.bf16.msra.mxu0 %v1150_v12  ;;  %505 = vmatprep.mubr.bf16.mxu0 %v1254_v38  ;;  %v1214_v6 = vld [vmem:[%s1596_s5 + $0x4c] ss:$12 sps:$4 sm:$0xff]   ;;  %v1215_v7 = vld [vmem:[%s1596_s5 + $0x50] ss:$12 sps:$4 sm:$0xff]   ;;  %v1218_v9 = vld [vmem:[%s1596_s5 + $0x34] ss:$12 sps:$4 sm:$0xff]  }
  0x20   :  { %475 = vmatprep.subr.bf16.mxu0 %v1158_v15  ;;  %v1219_v10 = vld [vmem:[%s1596_s5 + $0x38] ss:$12 sps:$4 sm:$0xff]   ;;  %v1216_v11 = vld [vmem:[%s1596_s5 + $0x30] ss:$12 sps:$4 sm:$0xff]   ;;  %v1223_v13 = vld [vmem:[%s1596_s5 + $0x20] ss:$12 sps:$4 sm:$0xff]  }
  0x21   :  { %429 = vmatpush1.bf16.msra.mxu1 %v1177_v20  ;;  %v1222_v12 = vld [vmem:[%s1596_s5 + $0x1c] ss:$12 sps:$4 sm:$0xff]   ;;  %v1220_v14 = vld [vmem:[%s1596_s5 + $0x18] ss:$12 sps:$4 sm:$0xff]   ;;  %v1255_v18 = vmov 0.0   ;;  %v1491_v20 = vshrl.u32 %v44_v19, 7 }
  0x22   :  { %430 = vmatprep.subr.bf16.mxu1 %v1178_v26  ;;  %v1226_v15 = vld [vmem:[%s1596_s5 + $0x4] ss:$12 sps:$4 sm:$0xff]   ;;  %vm1256_vm0 = vmmov 0  }
  0x23   :  { %476 = vmatpush1.bf16.msra.mxu0 %v1156_v16  ;;  %v1227_v16 = vld [vmem:[%s1596_s5 + $0x8] ss:$12 sps:$4 sm:$0xff]   ;;  %vm530_vm5 = vcmp.lt.s32.totalorder %v1491_v20, 1  ;;  %vm547_vm8 = vcmp.lt.s32.totalorder %v1491_v20, 7 }
  0x24   :  { %477 = vmatprep.subr.bf16.mxu0 %v1164_v17  ;;  %v1224_v17 = vld [vmem:[%s1596_s5] ss:$12 sps:$4 sm:$0xff]  }
  0x25   :  { %431 = vmatpush1.bf16.msra.mxu1 %v1183_v29 }
  0x26   :  { %432 = vmatprep.subr.bf16.mxu1 %v1184_v30 }
  0x27   :  { %478 = vmatpush1.bf16.msra.mxu0 %v1162_v21 }
  0x28   :  { %479 = vmatprep.subr.bf16.mxu0 %v1170_v22 }
  0x29   :  { %433 = vmatpush1.bf16.msra.mxu1 %v1189_v33 }
  0x2a   :  { %434 = vmatprep.subr.bf16.mxu1 %v1190_v34 }
  0x2b   :  { %480 = vmatpush1.bf16.msra.mxu0 %v1168_v23  ;;  %v46_v23 = vadd.s32 8, %v1491_v20 }
  0x2c   :  { %481 = vmatprep.subr.bf16.mxu0 %v1176_v24  ;;  %v47_v24 = vadd.s32 16, %v1491_v20 }
  0x2d   :  { %435 = vmatpush1.bf16.msra.mxu1 %v1195_v37  ;;  %v60_v29 = vand.u32 15, %v46_v23 }
  0x2e   :  { %745 = vmatprep.subr.bf16.mxu1 %v1198_v39 }
  0x2f   :  { %482 = vmatpush1.bf16.msra.mxu0 %v1174_v25  ;;  %vm1503_vm6 = vcmp.ne.s32.totalorder %v60_v29, 15 }
  0x30   :  { %483 = vmatprep.subr.bf16.mxu0 %v1182_v27 }
  0x33   :  { %484 = vmatpush1.bf16.msra.mxu0 %v1180_v28 }
  0x34   :  { %485 = vmatprep.subr.bf16.mxu0 %v1188_v31  ;;  %v67_v31 = vand.u32 15, %v47_v24 }
  0x36   :  { %vm1508_vm7 = vcmp.ne.s32.totalorder %v67_v31, 0 }
  0x37   :  { %486 = vmatpush1.bf16.msra.mxu0 %v1186_v32 }
  0x38   :  { %487 = vmatprep.subr.bf16.mxu0 %v1194_v35  ;;  %v48_v35 = vadd.s32 24, %v1491_v20 }
  0x3b   :  { %488 = vmatpush1.bf16.msra.mxu0 %v1192_v36 }
  0x3c   :  { %1100 = vmatprep.subr.bf16.mxu0 %v1199_v40 }
  0xde   :  { %v1098_v41 = vpop.f32.mrf.mxu0 }
  0xdf   :  { %v208_v51 = vadd.f32 %v1098_v41, %v996_v42  ;;  %v53_v41 = vand.u32 15, %v1491_v20  ;;  %v1062_v20 = vld [vmem:[%s1597_s6] ss:$0 sm:$0xff] }
  0xe0   :  { %v199_v43 = vpop.f32.mrf.mxu0 }
  0xe1   :  { %v200_v44 = vadd.f32 %v996_v42, %v199_v43  ;;  %v220_v57 = vmul.f32 0.2, %v208_v51  ;;  %vm216_vm4 = vcmp.ge.f32.partialorder %v208_v51, 0.0  ;;  %vm1521_vm9 = vcmp.ne.s32.totalorder %v53_v41, 0 }
  0xe2   :  { %v1099_v45 = vpop.f32.mrf.mxu0 }
  0xe3   :  { %v218_v47 = vmul.f32 0.2, %v200_v44  ;;  %vm214_vm1 = vcmp.ge.f32.partialorder %v200_v44, 0.0  ;;  %v211_v49 = vadd.f32 %v1099_v45, %v996_v42  ;;  %v224_v59 = vsel %vm216_vm4, %v208_v51, %v220_v57 }
  0xe4   :  { %v202_v46 = vpop.f32.mrf.mxu0 }
  0xe5   :  { %v203_v48 = vadd.f32 %v996_v42, %v202_v46  ;;  %v222_v52 = vsel %vm214_vm1, %v200_v44, %v218_v47  ;;  %v221_v56 = vmul.f32 0.2, %v211_v49  ;;  %vm217_vm3 = vcmp.ge.f32.partialorder %v211_v49, 0.0 }
  0xe7   :  { %vm215_vm2 = vcmp.ge.f32.partialorder %v203_v48, 0.0  ;;  %v219_v50 = vmul.f32 0.2, %v203_v48  ;;  %v225_v58 = vsel %vm217_vm3, %v211_v49, %v221_v56 }
  0xe8   :  { %v259_v60 = vpack.c.bf16 %v225_v58, %v224_v59 }
  0xe9   :  { %v223_v53 = vsel %vm215_vm2, %v203_v48, %v219_v50  ;;  %v74_v48 = vand.u32 15, %v48_v35 }
  0xea   :  { %v258_v54 = vpack.c.bf16 %v223_v53, %v222_v52 }
  0xeb   :  { %vm1528_vm10 = vcmp.ne.s32.totalorder %v74_v48, 15 }
  0xec   :  { %453 = vmatmul.mubr.bf16.vlgmr.msra.gmra.mxu1 %v258_v54  ;;  %506 = vmatmul.mubr.bf16.vlgmr.msra.gmra.mxu0 %v258_v54 }
  0xed   :  { %462 = vmatprep.mubr.bf16.mxu1 %v1254_v38  ;;  %515 = vmatprep.mubr.bf16.mxu0 %v1254_v38 }
  0xee   :  { %746 = vmatpush1.bf16.msra.mxu1 %v1196_v55  ;;  %1101 = vmatpush3.bf16.msra.mxu0 %v1199_v40 }
  0xef   :  { %747 = vmatprep.subr.bf16.mxu1 %v1202_v61  ;;  %1102 = vmatprep.subr.bf16.mxu0 %v1203_v62 }
  0xf2   :  { %748 = vmatpush1.bf16.msra.mxu1 %v1200_v63  ;;  %1103 = vmatpush3.bf16.msra.mxu0 %v1203_v62  ;;  %v1037_v62 = vld [vmem:[%s1595_s4] ss:$0 sm:$0xff] }
  0xf3   :  { %749 = vmatprep.subr.bf16.mxu1 %v1206_v0  ;;  %1104 = vmatprep.subr.bf16.mxu0 %v1207_v1 }
  0xf4   :  { %463 = vmatmul.mubr.bf16.gmra.mxu1 %v259_v60  ;;  %516 = vmatmul.mubr.bf16.gmra.mxu0 %v259_v60 }
  0xf5   :  { %777 = vmatprep.mubr.bf16.mxu1 %v1254_v38 }
  0xf6   :  { %750 = vmatpush1.bf16.msra.mxu1 %v1204_v2  ;;  %1105 = vmatpush3.bf16.msra.mxu0 %v1207_v1 }
  0xf7   :  { %751 = vmatprep.subr.bf16.mxu1 %v1210_v3  ;;  %1106 = vmatprep.subr.bf16.mxu0 %v1211_v4 }
  0xfa   :  { %752 = vmatpush1.bf16.msra.mxu1 %v1208_v5  ;;  %1107 = vmatpush3.bf16.msra.mxu0 %v1211_v4 }
  0xfb   :  { %753 = vmatprep.subr.bf16.mxu1 %v1214_v6  ;;  %1108 = vmatprep.subr.bf16.mxu0 %v1215_v7 }
  0xfe   :  { %754 = vmatpush1.bf16.msra.mxu1 %v1212_v8  ;;  %1109 = vmatpush3.bf16.msra.mxu0 %v1215_v7 }
  0xff   :  { %755 = vmatprep.subr.bf16.mxu1 %v1218_v9  ;;  %1110 = vmatprep.subr.bf16.mxu0 %v1219_v10 }
 0x102   :  { %756 = vmatpush1.bf16.msra.mxu1 %v1216_v11  ;;  %1111 = vmatpush3.bf16.msra.mxu0 %v1219_v10 }
 0x103   :  { %757 = vmatprep.subr.bf16.mxu1 %v1222_v12  ;;  %1112 = vmatprep.subr.bf16.mxu0 %v1223_v13 }
 0x106   :  { %758 = vmatpush1.bf16.msra.mxu1 %v1220_v14  ;;  %1113 = vmatpush3.bf16.msra.mxu0 %v1223_v13 }
 0x107   :  { %759 = vmatprep.subr.bf16.mxu1 %v1226_v15  ;;  %1114 = vmatprep.subr.bf16.mxu0 %v1227_v16 }
 0x10a   :  { %760 = vmatpush1.bf16.msra.mxu1 %v1224_v17  ;;  %1115 = vmatpush3.bf16.msra.mxu0 %v1227_v16 }
 0x10b   :  { %1128 = vmatprep.subr.bf16.mxu0 %v1255_v18  ;;  %1120 = vmatprep.subr.bf16.mxu1 %v1255_v18 }
 0x1ac   :  { %v454_v21 = vpop.f32.mrf.mxu1  ;;  %v507_v22 = vpop.f32.mrf.mxu0 }
 0x1ad   :  { %v526_v32 = vrot.slane %v454_v21, 7  ;;  %v543_v61 = vrot.slane %v507_v22, 1 }
 0x1ae   :  { %v456_v25 = vpop.f32.mrf.mxu1  ;;  %v1495_v26 = vpop.f32.mrf.mxu0 }
 0x1b0   :  { %v458_v27 = vpop.f32.mrf.mxu1  ;;  %v511_v28 = vpop.f32.mrf.mxu0 }
 0x1b1   :  { %v527_v30 = vrot.slane %v458_v27, 7  ;;  %v544_v42 = vrot.slane %v511_v28, 1 }
 0x1b2   :  { %v460_v33 = vpop.f32.mrf.mxu1  ;;  %v1498_v34 = vpop.f32.mrf.mxu0 }
 0x1b3   :  { %v533_v36 = vsel %vm530_vm5, %v526_v32, %v527_v30  ;;  %v550_v11 = vsel %vm547_vm8, %v543_v61, %v544_v42 }
 0x1b4   :  { %v464_v37 = vpop.f32.mrf.mxu1  ;;  %v517_v40 = vpop.f32.mrf.mxu0  ;;  %v540_v49 = vadd.f32 %v533_v36, %v460_v33  ;;  %v1228_v33 = vld [vmem:[%s1598_s7] sm:$0xff]  }
 0x1b5   :  { %v528_v43 = vrot.slane %v464_v37, 7  ;;  %v545_v44 = vrot.slane %v517_v40, 1 }
 0x1b6   :  { %v466_v46 = vpop.f32.mrf.mxu1  ;;  %v519_v47 = vpop.f32.mrf.mxu0 }
 0x1b7   :  { %v549_v50 = vsel %vm547_vm8, %v544_v42, %v545_v44  ;;  %v532_v51 = vsel %vm530_vm5, %v527_v30, %v528_v43 }
 0x1b8   :  { %v553_v52 = vsel %vm1503_vm6, %v549_v50, 0.0  ;;  %v537_v53 = vsel %vm1508_vm7, %v532_v51, 0.0  ;;  %v468_v55 = vpop.f32.mrf.mxu1  ;;  %v521_v56 = vpop.f32.mrf.mxu0 }
 0x1b9   :  { %v557_v57 = vadd.f32 %v553_v52, %v540_v49  ;;  %v541_v58 = vadd.f32 %v537_v53, %v466_v46  ;;  %v529_v59 = vrot.slane %v468_v55, 7  ;;  %v546_v60 = vrot.slane %v521_v56, 1 }
 0x1ba   :  { %v470_v0 = vpop.f32.mrf.mxu1  ;;  %v523_v24 = vpop.f32.mrf.mxu0 }
 0x1bb   :  { %v534_v1 = vsel %vm530_vm5, %v529_v59, %v526_v32  ;;  %v548_v2 = vsel %vm547_vm8, %v545_v44, %v546_v60  ;;  %v531_v3 = vsel %vm530_vm5, %v528_v43, %v529_v59  ;;  %v551_v7 = vsel %vm547_vm8, %v546_v60, %v543_v61 }
 0x1bc   :  { %v535_v4 = vsel %vm1521_vm9, %v534_v1, 0.0  ;;  %v558_v5 = vadd.f32 %v548_v2, %v541_v58  ;;  %v542_v6 = vadd.f32 %v531_v3, %v470_v0  ;;  %v568_v9 = vadd.f32 %v1037_v62, %v557_v57 }
 0x1bd   :  { %v539_v8 = vadd.f32 %v535_v4, %v456_v25  ;;  %v555_v10 = vsel %vm1528_vm10, %v551_v7, 0.0  ;;  %v882_v31 = vpack.c.bf16 %v523_v24, %v519_v47  ;;  %v881_v32 = vpack.c.bf16 %v1498_v34, %v1495_v26 }
 0x1be   :  { %v569_v12 = vadd.f32 %v1037_v62, %v558_v5  ;;  %v559_v13 = vadd.f32 %v555_v10, %v542_v6  ;;  %v576_v17 = vmul.f32 0.2, %v568_v9  ;;  %vm572_vm12 = vcmp.ge.f32.partialorder %v568_v9, 0.0 }
 0x1bf   :  { %v556_v14 = vadd.f32 %v550_v11, %v539_v8 }
 0x1c0   :  { %v570_v15 = vadd.f32 %v1037_v62, %v559_v13  ;;  %v577_v19 = vmul.f32 0.2, %v569_v12  ;;  %vm573_vm13 = vcmp.ge.f32.partialorder %v569_v12, 0.0  ;;  %v580_v27 = vsel %vm572_vm12, %v568_v9, %v576_v17 }
 0x1c1   :  { %v567_v16 = vadd.f32 %v1037_v62, %v556_v14 }
 0x1c2   :  { %vm574_vm11 = vcmp.ge.f32.partialorder %v570_v15, 0.0  ;;  %v578_v21 = vmul.f32 0.2, %v570_v15  ;;  %v581_v28 = vsel %vm573_vm13, %v569_v12, %v577_v19 }
 0x1c3   :  { %vm571_vm14 = vcmp.ge.f32.partialorder %v567_v16, 0.0  ;;  %v575_v22 = vmul.f32 0.2, %v567_v16 }
 0x1c4   :  { %v582_v23 = vsel %vm574_vm11, %v570_v15, %v578_v21 }
 0x1c5   :  { %v579_v25 = vsel %vm571_vm14, %v567_v16, %v575_v22  ;;  %v616_v30 = vpack.c.bf16 %v582_v23, %v581_v28 }
 0x1c6   :  { %v615_v29 = vpack.c.bf16 %v580_v27, %v579_v25 }
 0x1c8   :  { %778 = vmatmul.mubr.bf16.vlgmr.msra.gmra.mxu1 %v615_v29  ;;  %1116 = vmatprep.mubr.bf16.mxu0 %v615_v29 }
 0x1c9   :  { %1117 = vmatmul.mubr.bf16.vlgmr.msra.gmra.mxu0 %v616_v30  ;;  %787 = vmatprep.mubr.bf16.mxu1 %v1254_v38 }
 0x1ca   :  { %1129 = vmatpush3.bf16.msra.mxu0 %v882_v31  ;;  %1132 = vmatprep.mubr.msk.bf16.mxu0 %vm1256_vm0, %v1255_v18 }
 0x1cb   :  { %1130 = vmatprep.subr.bf16.mxu0 %v1255_v18 }
 0x1ce   :  { %1131 = vmatpush3.bf16.msra.mxu0 %v881_v32 }
 0x1d0   :  { %788 = vmatmul.mubr.bf16.gmra.mxu1 %v616_v30 }
 0x1d1   :  { %1124 = vmatprep.mubr.msk.bf16.mxu1 %vm1256_vm0, %v1255_v18  ;;  %1133 = vmatmul.mubr.msk.bf16.vlgmr.msra.gmra.mxu0 %vm897_vm15, %v1228_v33 }
 0x288   :  { %v779_v38 = vpop.f32.mrf.mxu1 }
 0x289   :  { %v1118_v35 = vpop.f32.mrf.mxu0  ;;  %v847_v53 = vrot.slane %v779_v38, 7 }
 0x28a   :  { %v781_v36 = vpop.f32.mrf.mxu1  ;;  %v865_v56 = vrot.slane %v1118_v35, 1 }
 0x28b   :  { %v832_v37 = vpop.f32.mrf.mxu0 }
 0x28c   :  { %v783_v40 = vpop.f32.mrf.mxu1  ;;  %v863_v49 = vrot.slane %v832_v37, 1 }
 0x28d   :  { %v1119_v26 = vpop.f32.mrf.mxu0  ;;  %v848_v42 = vrot.slane %v783_v40, 7 }
 0x28e   :  { %v785_v34 = vpop.f32.mrf.mxu1  ;;  %v866_v46 = vrot.slane %v1119_v26, 1 }
 0x28f   :  { %v835_v43 = vpop.f32.mrf.mxu0  ;;  %v853_v1 = vsel %vm530_vm5, %v847_v53, %v848_v42 }
 0x290   :  { %v789_v41 = vpop.f32.mrf.mxu1  ;;  %v864_v50 = vrot.slane %v835_v43, 1  ;;  %v870_v59 = vsel %vm547_vm8, %v866_v46, %v863_v49  ;;  %v867_v2 = vsel %vm547_vm8, %v865_v56, %v866_v46  ;;  %v860_v8 = vadd.f32 %v853_v1, %v785_v34 }
 0x291   :  { %v849_v44 = vrot.slane %v789_v41, 7  ;;  %v874_v4 = vsel %vm1528_vm10, %v870_v59, 0.0  ;;  %v982_v63 = vpop.f32.mrf.mxu0 }
 0x292   :  { %v791_v47 = vpop.f32.mrf.mxu1  ;;  %v868_v62 = vsel %vm547_vm8, %v864_v50, %v865_v56  ;;  %v869_v7 = vsel %vm547_vm8, %v863_v49, %v864_v50 }
 0x293   :  { %v852_v48 = vsel %vm530_vm5, %v848_v42, %v849_v44  ;;  %v872_v54 = vsel %vm1503_vm6, %v868_v62, 0.0  ;;  %v1134_v13 = vpop.f32.mrf.mxu0 }
 0x294   :  { %v857_v51 = vsel %vm1508_vm7, %v852_v48, 0.0  ;;  %v793_v52 = vpop.f32.mrf.mxu1  ;;  %v876_v11 = vadd.f32 %v872_v54, %v860_v8 }
 0x295   :  { %v850_v55 = vrot.slane %v793_v52, 7  ;;  %v861_v57 = vadd.f32 %v857_v51, %v791_v47  ;;  %v985_v14 = vpop.f32.mrf.mxu0 }
 0x296   :  { %v795_v58 = vpop.f32.mrf.mxu1 }
 0x297   :  { %v854_v60 = vsel %vm530_vm5, %v850_v55, %v847_v53  ;;  %v851_v61 = vsel %vm530_vm5, %v849_v44, %v850_v55  ;;  %v877_v5 = vadd.f32 %v867_v2, %v861_v57  ;;  %v1135_v15 = vpop.f32.mrf.mxu0 }
 0x298   :  { %v855_v45 = vsel %vm1521_vm9, %v854_v60, 0.0  ;;  %v862_v0 = vadd.f32 %v851_v61, %v795_v58 }
 0x299   :  { %v859_v3 = vadd.f32 %v855_v45, %v781_v36 }
 0x29a   :  { %v878_v6 = vadd.f32 %v874_v4, %v862_v0 }
 0x29b   :  { %v875_v9 = vadd.f32 %v869_v7, %v859_v3 }
 0x29c   :  { %v884_v10 = vpack.c.bf16 %v878_v6, %v877_v5 }
 0x29d   :  { %v883_v12 = vpack.c.bf16 %v876_v11, %v875_v9 }
 0x29e   :  { %1121 = vmatpush3.bf16.msra.mxu1 %v884_v10 }
 0x29f   :  { %1122 = vmatprep.subr.bf16.mxu1 %v1255_v18 }
 0x2a2   :  { %1123 = vmatpush3.bf16.msra.mxu1 %v883_v12 }
 0x2a5   :  { %1125 = vmatmul.mubr.msk.bf16.vlgmr.msra.gmra.mxu1 %vm897_vm15, %v1228_v33 }
 0x365   :  { %v935_v39 = vpop.f32.mrf.mxu1 }
 0x366   :  { %v936_v16 = vadd.f32 %v1062_v20, %v935_v39 }
 0x367   :  { %v1126_v17 = vpop.f32.mrf.mxu1 }
 0x368   :  { %v944_v19 = vmul.f32 0.2, %v936_v16  ;;  %vm942_vm1 = vcmp.ge.f32.partialorder %v936_v16, 0.0 }
 0x369   :  { %v938_v21 = vpop.f32.mrf.mxu1 }
 0x36a   :  { %v939_v22 = vadd.f32 %v1062_v20, %v938_v21  ;;  %v946_v18 = vsel %vm942_vm1, %v936_v16, %v944_v19 }
 0x36b   :  { %v983_v23 = vadd.f32 %v982_v63, %v946_v18  ;;  %v1127_v24 = vpop.f32.mrf.mxu1 }
 0x36c   :  { %v945_v25 = vmul.f32 0.2, %v939_v22  ;;  %vm943_vm2 = vcmp.ge.f32.partialorder %v939_v22, 0.0 }
 0x36d   :  { %989 = vst [vmem:[%s1599_s8] sm:$0xff] %v983_v23 }
 0x36e   :  { %v947_v27 = vsel %vm943_vm2, %v939_v22, %v945_v25 }
 0x36f   :  { %v986_v28 = vadd.f32 %v985_v14, %v947_v27 }
 0x371   :  { %990 = vst [vmem:[%s1599_s8 + $0x8] sm:$0xff] %v986_v28 }
 0x372   :  { %995 = vsyncpa [#allocation3], 1 }

</bundles_post_ra>
